<compile_context>
chip_gen: v6e
topology: v6e:2x2x1
jax: 0.10.0
libtpu: 0.0.40
codegen_flags: <defaults>
</compile_context>

<pallas_src>
import functools
import math

import jax
import jax.numpy as jnp
from jax import lax
from jax.experimental import pallas as pl
from jax.experimental.pallas import tpu as pltpu


def _mha_kernel(x_ref, wq_ref, wk_ref, wv_ref, wp_ref, bp_ref, o_ref, acc_ref,
                *, num_heads, head_dim):
    h = pl.program_id(1)

    @pl.when(h == 0)
    def _init():
        acc_ref[...] = jnp.zeros_like(acc_ref)

    x = x_ref[0]                                   # (T, d_in)
    T = x.shape[0]

    # Per-head QKV projections on the MXU (weights arrive already head-sliced
    # by the BlockSpec index_map -> no lane slicing of live values).
    q = jnp.dot(x, wq_ref[0], preferred_element_type=jnp.float32)   # (T, hd)
    k = jnp.dot(x, wk_ref[0], preferred_element_type=jnp.float32)   # (T, hd)
    v = jnp.dot(x, wv_ref[0], preferred_element_type=jnp.float32)   # (T, hd)

    # q . k^T without materializing a transpose: contract the last dim of both.
    s = lax.dot_general(q, k, (((1,), (1,)), ((), ())),
                        preferred_element_type=jnp.float32)         # (T, T)
    s = s * (1.0 / math.sqrt(head_dim))

    # Causal mask: allow col <= row. Large finite negative (not -inf) so a row
    # with no allowed columns (e.g. future padding) cannot produce NaN.
    row = lax.broadcasted_iota(jnp.int32, (T, T), 0)
    col = lax.broadcasted_iota(jnp.int32, (T, T), 1)
    s = jnp.where(col <= row, s, -1e30)

    # Softmax with normalization deferred past the P@V matmul.
    m = jnp.max(s, axis=-1, keepdims=True)
    p = jnp.exp(s - m)
    l = jnp.sum(p, axis=-1, keepdims=True)

    ctx = jnp.dot(p, v, preferred_element_type=jnp.float32)         # (T, hd)
    ctx = ctx * pl.reciprocal(l, approx=True)                       # EUP, not VALU div

    # Per-head slice of the output projection, accumulated into a lane-dense
    # (T, d_out) f32 scratch; removes the head concatenate entirely.
    acc_ref[...] += jnp.dot(ctx, wp_ref[0], preferred_element_type=jnp.float32)

    @pl.when(h == num_heads - 1)
    def _finalize():
        o_ref[0] = (acc_ref[...] + bp_ref[...]).astype(o_ref.dtype)


def multihead_attention(x, wq, wk, wv, wp, bp, *, num_heads):
    """x: (B, T, d_in); wq/wk/wv: (d_in, d_out); wp: (d_out, d_out); bp: (1, d_out)."""
    B, T, d_in = x.shape
    d_out = wq.shape[1]
    assert d_out % num_heads == 0
    head_dim = d_out // num_heads

    # Pre-reshape weights (one-time XLA op outside the kernel) so the head
    # split becomes free BlockSpec addressing.
    wq_h = wq.reshape(d_in, num_heads, head_dim).transpose(1, 0, 2)   # (H, d_in, hd)
    wk_h = wk.reshape(d_in, num_heads, head_dim).transpose(1, 0, 2)   # (H, d_in, hd)
    wv_h = wv.reshape(d_in, num_heads, head_dim).transpose(1, 0, 2)   # (H, d_in, hd)
    wp_h = wp.reshape(num_heads, head_dim, d_out)                     # (H, hd, d_out)

    kernel = functools.partial(_mha_kernel, num_heads=num_heads, head_dim=head_dim)

    return pl.pallas_call(
        kernel,
        out_shape=jax.ShapeDtypeStruct((B, T, d_out), x.dtype),
        grid_spec=pltpu.PrefetchScalarGridSpec(
            num_scalar_prefetch=0,
            grid=(B, num_heads),
            in_specs=[
                # x: constant across the head axis -> fetched once per batch step.
                pl.BlockSpec((1, T, d_in), lambda b, h: (b, 0, 0)),
                # per-head weight slices (grid-invariant in b, indexed by h).
                pl.BlockSpec((1, d_in, head_dim), lambda b, h: (h, 0, 0)),   # W_query
                pl.BlockSpec((1, d_in, head_dim), lambda b, h: (h, 0, 0)),   # W_key
                pl.BlockSpec((1, d_in, head_dim), lambda b, h: (h, 0, 0)),   # W_value
                pl.BlockSpec((1, head_dim, d_out), lambda b, h: (h, 0, 0)),  # proj rows
                pl.BlockSpec((1, d_out), lambda b, h: (0, 0)),               # proj bias
            ],
            # Same output block across the head axis -> resident accumulator slab,
            # written once (lane-dense (T, d_out) store) at the last head.
            out_specs=pl.BlockSpec((1, T, d_out), lambda b, h: (b, 0, 0)),
            scratch_shapes=[pltpu.VMEM((T, d_out), jnp.float32)],
        ),
        compiler_params=pltpu.CompilerParams(
            dimension_semantics=("parallel", "arbitrary")),
    )(x, wq_h, wk_h, wv_h, wp_h, bp)


def _reference(x, wq, wk, wv, wp, bp, *, num_heads):
    B, T, d_in = x.shape
    d_out = wq.shape[1]
    hd = d_out // num_heads
    q = (x @ wq).reshape(B, T, num_heads, hd).transpose(0, 2, 1, 3)
    k = (x @ wk).reshape(B, T, num_heads, hd).transpose(0, 2, 1, 3)
    v = (x @ wv).reshape(B, T, num_heads, hd).transpose(0, 2, 1, 3)
    s = jnp.einsum("bhqd,bhkd->bhqk", q, k)
    mask = jnp.triu(jnp.ones((T, T), bool), k=1)
    s = jnp.where(mask[None, None], -jnp.inf, s)
    p = jax.nn.softmax(s / math.sqrt(hd), axis=-1)
    ctx = jnp.einsum("bhqk,bhkd->bhqd", p, v).transpose(0, 2, 1, 3).reshape(B, T, d_out)
    return ctx @ wp + bp


if __name__ == "__main__":
    # Small shapes consistent with the module's forward.
    B, T, D_IN, D_OUT, NUM_HEADS = 2, 8, 32, 32, 4

    key = jax.random.PRNGKey(0)
    kx, kq, kk, kv, kp, kb = jax.random.split(key, 6)

    x = jax.random.normal(kx, (B, T, D_IN), dtype=jnp.float32)
    # nn.Linear(d_in, d_out, bias=False) weights, stored pre-transposed (d_in, d_out)
    wq = jax.random.normal(kq, (D_IN, D_OUT), dtype=jnp.float32) * 0.1
    wk = jax.random.normal(kk, (D_IN, D_OUT), dtype=jnp.float32) * 0.1
    wv = jax.random.normal(kv, (D_IN, D_OUT), dtype=jnp.float32) * 0.1
    # nn.Linear(d_out, d_out) with bias for the output projection
    wp = jax.random.normal(kp, (D_OUT, D_OUT), dtype=jnp.float32) * 0.1
    bp = jax.random.normal(kb, (1, D_OUT), dtype=jnp.float32) * 0.1

    out = multihead_attention(x, wq, wk, wv, wp, bp, num_heads=NUM_HEADS)
    out = jax.block_until_ready(out)

    ref = _reference(x, wq, wk, wv, wp, bp, num_heads=NUM_HEADS)
    assert out.shape == (B, T, D_OUT)
    # Slightly relaxed tolerance: softmax denominator uses the EUP approx reciprocal.
    assert jnp.allclose(out, ref, atol=1e-3, rtol=1e-3), "mismatch vs JAX reference"

    print("KERNEL_OK")
</pallas_src>

<mosaic_0001>
module attributes {stable_mosaic.version = 11 : i64} {
  func.func @_mha_kernel(%arg0: i32, %arg1: i32, %arg2: memref<1x8x32xf32, #tpu.memory_space<vmem>>, %arg3: memref<1x32x8xf32, #tpu.memory_space<vmem>>, %arg4: memref<1x32x8xf32, #tpu.memory_space<vmem>>, %arg5: memref<1x32x8xf32, #tpu.memory_space<vmem>>, %arg6: memref<1x8x32xf32, #tpu.memory_space<vmem>>, %arg7: memref<1x32xf32, #tpu.memory_space<vmem>>, %arg8: memref<1x8x32xf32, #tpu.memory_space<vmem>>, %arg9: memref<8x32xf32, #tpu.memory_space<vmem>>) attributes {dimension_semantics = [#tpu.dimension_semantics<parallel>, #tpu.dimension_semantics<arbitrary>], iteration_bounds = array<i64: 2, 4>, scalar_prefetch = 0 : i64, scratch_operands = 1 : i64, tpu.core_type = #tpu.core_type<tc>, window_params = [{transform_indices = @transform_0, window_bounds = array<i64: 1, 8, 32>}, {transform_indices = @transform_1, window_bounds = array<i64: 1, 32, 8>}, {transform_indices = @transform_2, window_bounds = array<i64: 1, 32, 8>}, {transform_indices = @transform_3, window_bounds = array<i64: 1, 32, 8>}, {transform_indices = @transform_4, window_bounds = array<i64: 1, 8, 32>}, {pipeline_mode = #tpu.pipeline_mode<synchronous>, transform_indices = @transform_5, window_bounds = array<i64: 1, 32>}, {transform_indices = @transform_6, window_bounds = array<i64: 1, 8, 32>}]} {
    %c0_i32 = arith.constant 0 : i32
    %0 = arith.cmpi eq, %arg1, %c0_i32 : i32
    %1 = arith.extui %0 : i1 to i32
    %c0_i32_0 = arith.constant 0 : i32
    %2 = arith.cmpi ne, %1, %c0_i32_0 : i32
    scf.if %2 {
      %cst_29 = arith.constant 0.000000e+00 : f32
      %42 = vector.broadcast %cst_29 : f32 to vector<8x32xf32>
      %c0_30 = arith.constant 0 : index
      %c0_31 = arith.constant 0 : index
      %43 = vector.load %arg9[%c0_30, %c0_31] : memref<8x32xf32, #tpu.memory_space<vmem>>, vector<8x32xf32>
      tpu.vector_store %arg9[%c0_30, %c0_31], %42 {strides = array<i32>} : memref<8x32xf32, #tpu.memory_space<vmem>>, vector<8x32xf32>,
    } else {
    }
    %c0 = arith.constant 0 : index
    %c0_1 = arith.constant 0 : index
    %c0_2 = arith.constant 0 : index
    %3 = vector.load %arg2[%c0, %c0_1, %c0_2] : memref<1x8x32xf32, #tpu.memory_space<vmem>>, vector<1x8x32xf32>
    %4 = vector.shape_cast %3 : vector<1x8x32xf32> to vector<8x32xf32>
    %c0_3 = arith.constant 0 : index
    %c0_4 = arith.constant 0 : index
    %c0_5 = arith.constant 0 : index
    %5 = vector.load %arg3[%c0_3, %c0_4, %c0_5] : memref<1x32x8xf32, #tpu.memory_space<vmem>>, vector<1x32x8xf32>
    %6 = vector.shape_cast %5 : vector<1x32x8xf32> to vector<32x8xf32>
    %cst = arith.constant dense<0.000000e+00> : vector<8x8xf32>
    %7 = tpu.matmul %4, %6, %cst {dimension_numbers = #tpu.dot_dimension_numbers<[1], [0], [0], [1], [0, 0, 1, 1], [], []>} : vector<8x32xf32>, vector<32x8xf32>, vector<8x8xf32> -> vector<8x8xf32>
    %c0_6 = arith.constant 0 : index
    %c0_7 = arith.constant 0 : index
    %c0_8 = arith.constant 0 : index
    %8 = vector.load %arg4[%c0_6, %c0_7, %c0_8] : memref<1x32x8xf32, #tpu.memory_space<vmem>>, vector<1x32x8xf32>
    %9 = vector.shape_cast %8 : vector<1x32x8xf32> to vector<32x8xf32>
    %cst_9 = arith.constant dense<0.000000e+00> : vector<8x8xf32>
    %10 = tpu.matmul %4, %9, %cst_9 {dimension_numbers = #tpu.dot_dimension_numbers<[1], [0], [0], [1], [0, 0, 1, 1], [], []>} : vector<8x32xf32>, vector<32x8xf32>, vector<8x8xf32> -> vector<8x8xf32>
    %c0_10 = arith.constant 0 : index
    %c0_11 = arith.constant 0 : index
    %c0_12 = arith.constant 0 : index
    %11 = vector.load %arg5[%c0_10, %c0_11, %c0_12] : memref<1x32x8xf32, #tpu.memory_space<vmem>>, vector<1x32x8xf32>
    %12 = vector.shape_cast %11 : vector<1x32x8xf32> to vector<32x8xf32>
    %cst_13 = arith.constant dense<0.000000e+00> : vector<8x8xf32>
    %13 = tpu.matmul %4, %12, %cst_13 {dimension_numbers = #tpu.dot_dimension_numbers<[1], [0], [0], [1], [0, 0, 1, 1], [], []>} : vector<8x32xf32>, vector<32x8xf32>, vector<8x8xf32> -> vector<8x8xf32>
    %cst_14 = arith.constant dense<0.000000e+00> : vector<8x8xf32>
    %14 = tpu.matmul %7, %10, %cst_14 {dimension_numbers = #tpu.dot_dimension_numbers<[1], [1], [0], [0], [0, 0, 1, 0], [], []>} : vector<8x8xf32>, vector<8x8xf32>, vector<8x8xf32> -> vector<8x8xf32>
    %cst_15 = arith.constant 0.353553385 : f32
    %15 = vector.broadcast %cst_15 : f32 to vector<8x8xf32>
    %16 = arith.mulf %14, %15 : vector<8x8xf32>
    %17 = tpu.iota {dimensions = array<i32: 0>} : vector<8x8xi32>
    %18 = tpu.iota {dimensions = array<i32: 1>} : vector<8x8xi32>
    %19 = arith.cmpi sle, %18, %17 : vector<8x8xi32>
    %cst_16 = arith.constant -1.000000e+30 : f32
    %20 = vector.broadcast %cst_16 : f32 to vector<8x8xf32>
    %21 = arith.select %19, %16, %20 : vector<8x8xi1>, vector<8x8xf32>
    %cst_17 = arith.constant dense<0xFF800000> : vector<8xf32>
    %22 = vector.multi_reduction <maximumf>, %21, %cst_17 [1] : vector<8x8xf32> to vector<8xf32>
    %23 = vector.shape_cast %22 : vector<8xf32> to vector<8x1xf32>
    %24 = vector.broadcast %23 : vector<8x1xf32> to vector<8x8xf32>
    %25 = arith.subf %21, %24 : vector<8x8xf32>
    %26 = math.exp %25 : vector<8x8xf32>
    %cst_18 = arith.constant dense<0.000000e+00> : vector<8xf32>
    %27 = vector.multi_reduction <add>, %26, %cst_18 [1] : vector<8x8xf32> to vector<8xf32>
    %28 = vector.shape_cast %27 : vector<8xf32> to vector<8x1xf32>
    %cst_19 = arith.constant dense<0.000000e+00> : vector<8x8xf32>
    %29 = tpu.matmul %26, %13, %cst_19 {dimension_numbers = #tpu.dot_dimension_numbers<[1], [0], [0], [1], [0, 0, 1, 1], [], []>} : vector<8x8xf32>, vector<8x8xf32>, vector<8x8xf32> -> vector<8x8xf32>
    %30 = tpu.reciprocal %28 {approx = true} : vector<8x1xf32> -> vector<8x1xf32>
    %31 = vector.broadcast %30 : vector<8x1xf32> to vector<8x8xf32>
    %32 = arith.mulf %29, %31 : vector<8x8xf32>
    %c0_20 = arith.constant 0 : index
    %c0_21 = arith.constant 0 : index
    %33 = vector.load %arg9[%c0_20, %c0_21] : memref<8x32xf32, #tpu.memory_space<vmem>>, vector<8x32xf32>
    %c0_22 = arith.constant 0 : index
    %c0_23 = arith.constant 0 : index
    %c0_24 = arith.constant 0 : index
    %34 = vector.load %arg6[%c0_22, %c0_23, %c0_24] : memref<1x8x32xf32, #tpu.memory_space<vmem>>, vector<1x8x32xf32>
    %35 = vector.shape_cast %34 : vector<1x8x32xf32> to vector<8x32xf32>
    %cst_25 = arith.constant dense<0.000000e+00> : vector<8x32xf32>
    %36 = tpu.matmul %32, %35, %cst_25 {dimension_numbers = #tpu.dot_dimension_numbers<[1], [0], [0], [1], [0, 0, 1, 1], [], []>} : vector<8x8xf32>, vector<8x32xf32>, vector<8x32xf32> -> vector<8x32xf32>
    %37 = arith.addf %33, %36 : vector<8x32xf32>
    %c0_26 = arith.constant 0 : index
    %c0_27 = arith.constant 0 : index
    %38 = vector.load %arg9[%c0_26, %c0_27] : memref<8x32xf32, #tpu.memory_space<vmem>>, vector<8x32xf32>
    tpu.vector_store %arg9[%c0_26, %c0_27], %37 {strides = array<i32>} : memref<8x32xf32, #tpu.memory_space<vmem>>, vector<8x32xf32>,
    %c3_i32 = arith.constant 3 : i32
    %39 = arith.cmpi eq, %arg1, %c3_i32 : i32
    %40 = arith.extui %39 : i1 to i32
    %c0_i32_28 = arith.constant 0 : i32
    %41 = arith.cmpi ne, %40, %c0_i32_28 : i32
    scf.if %41 {
      %c0_29 = arith.constant 0 : index
      %c0_30 = arith.constant 0 : index
      %42 = vector.load %arg9[%c0_29, %c0_30] : memref<8x32xf32, #tpu.memory_space<vmem>>, vector<8x32xf32>
      %c0_31 = arith.constant 0 : index
      %c0_32 = arith.constant 0 : index
      %43 = vector.load %arg7[%c0_31, %c0_32] : memref<1x32xf32, #tpu.memory_space<vmem>>, vector<1x32xf32>
      %44 = vector.broadcast %43 : vector<1x32xf32> to vector<8x32xf32>
      %45 = arith.addf %42, %44 : vector<8x32xf32>
      %c0_33 = arith.constant 0 : index
      %c0_34 = arith.constant 0 : index
      %c0_35 = arith.constant 0 : index
      %46 = vector.load %arg8[%c0_33, %c0_34, %c0_35] : memref<1x8x32xf32, #tpu.memory_space<vmem>>, vector<1x8x32xf32>
      %47 = vector.shape_cast %46 : vector<1x8x32xf32> to vector<8x32xf32>
      %48 = vector.shape_cast %45 : vector<8x32xf32> to vector<1x8x32xf32>
      tpu.vector_store %arg8[%c0_33, %c0_34, %c0_35], %48 {strides = array<i32>} : memref<1x8x32xf32, #tpu.memory_space<vmem>>, vector<1x8x32xf32>,
    } else {
    }
    return
  }
  func.func @transform_0(%arg0: i32, %arg1: i32) -> (i32, i32, i32) {
    %c0_i32 = arith.constant 0 : i32
    %c0_i32_0 = arith.constant 0 : i32
    %c0_i32_1 = arith.constant 0 : i32
    return %arg0, %c0_i32, %c0_i32_0 : i32, i32, i32
  }
  func.func @transform_1(%arg0: i32, %arg1: i32) -> (i32, i32, i32) {
    %c0_i32 = arith.constant 0 : i32
    %c0_i32_0 = arith.constant 0 : i32
    %c0_i32_1 = arith.constant 0 : i32
    return %arg1, %c0_i32, %c0_i32_0 : i32, i32, i32
  }
  func.func @transform_2(%arg0: i32, %arg1: i32) -> (i32, i32, i32) {
    %c0_i32 = arith.constant 0 : i32
    %c0_i32_0 = arith.constant 0 : i32
    %c0_i32_1 = arith.constant 0 : i32
    return %arg1, %c0_i32, %c0_i32_0 : i32, i32, i32
  }
  func.func @transform_3(%arg0: i32, %arg1: i32) -> (i32, i32, i32) {
    %c0_i32 = arith.constant 0 : i32
    %c0_i32_0 = arith.constant 0 : i32
    %c0_i32_1 = arith.constant 0 : i32
    return %arg1, %c0_i32, %c0_i32_0 : i32, i32, i32
  }
  func.func @transform_4(%arg0: i32, %arg1: i32) -> (i32, i32, i32) {
    %c0_i32 = arith.constant 0 : i32
    %c0_i32_0 = arith.constant 0 : i32
    %c0_i32_1 = arith.constant 0 : i32
    return %arg1, %c0_i32, %c0_i32_0 : i32, i32, i32
  }
  func.func @transform_5(%arg0: i32, %arg1: i32) -> (i32, i32) {
    %c0_i32 = arith.constant 0 : i32
    %c0_i32_0 = arith.constant 0 : i32
    %c0_i32_1 = arith.constant 0 : i32
    return %c0_i32, %c0_i32_0 : i32, i32
  }
  func.func @transform_6(%arg0: i32, %arg1: i32) -> (i32, i32, i32) {
    %c0_i32 = arith.constant 0 : i32
    %c0_i32_0 = arith.constant 0 : i32
    %c0_i32_1 = arith.constant 0 : i32
    return %arg0, %c0_i32, %c0_i32_0 : i32, i32, i32
  }
}

</mosaic_0001>

<bundles_post_ra>
// kernel: tpu_custom_call.1
= control target key start
LH: loop header
LB: loop body
LE: loop exit
PB: predicated region body
PF: predicated region fallthrough
CT: control target
= control target key end

     0   :  { %11 = vsyncpa [#allocation4], 0  ;;  %s1455_s0 = inlined_call_operand.vmem [shape: f32[2,8,32], index: 0, kind: input, shape index: {}]   ;;  %s1456_s1 = inlined_call_operand.vmem [shape: f32[4,32,8], index: 1, kind: input, shape index: {}]   ;;  %s1457_s2 = inlined_call_operand.vmem [shape: f32[4,32,8], index: 2, kind: input, shape index: {}]   ;;  %s1458_s3 = inlined_call_operand.vmem [shape: f32[4,32,8], index: 3, kind: input, shape index: {}]   ;;  %s1459_s4 = inlined_call_operand.vmem [shape: f32[4,8,32], index: 4, kind: input, shape index: {}]   ;;  %s1460_s5 = inlined_call_operand.vmem [shape: f32[1,32], index: 5, kind: input, shape index: {}]   ;;  %s1461_s6 = inlined_call_operand.hbm [shape: f32[2,8,32], index: 6, kind: output, shape index: {}]  }
   0x1   :  { %13 = vsyncpa [#allocation4 + $0x1], 0  ;;  %s1271_s21 = smov 0   ;;  %s1273_s22 = smov 0  }
   0x2   :  { %s1275_s23 = smov 0   ;;  %s1277_s24 = smov 0  }
   0x3   :  { %s1279_s25 = smov 0   ;;  %s1281_s26 = smov 0  }
   0x4   :  { %s1283_s27 = smov 0   ;;  %s1285_s28 = smov 0  }
   0x5 LB: > { %1468 = sst [smem:[#allocation6_spill]] %s1210_s23  ;;  %s960_s29 = sadd.s32 4294967295, %s1230_s28   ;;  %s1230_s28 = sphi %s1285_s28, %s19_s28   ;;  %s1226_s27 = sphi %s1283_s27, %s1487_s27   ;;  %s1222_s26 = sphi %s1281_s26, %s1483_s26   ;;  %s1218_s25 = sphi %s1279_s25, %s1482_s25   ;;  %s1214_s24 = sphi %s1277_s24, %s1481_s24   ;;  %s1210_s23 = sphi %s1275_s23, %s1480_s23   ;;  %s1206_s22 = sphi %s1273_s22, %s1486_s22   ;;  %s1202_s21 = sphi %s1271_s21, %s1485_s21  }
   0x6   : > { %1469 = sst [smem:[#allocation7_spill]] %s1222_s26  ;;  %s961_s30 = sadd.s32 4294967294, %s1230_s28  }
   0x7   : > { %1470 = sst [smem:[#allocation8_spill]] %s1226_s27  ;;  %s28_s7 = sadd.s32 1, %s1222_s26 }
   0x8   : > { %p29_p0 = scmp.ge.s32.totalorder %s28_s7, 4  ;;  %s31_s8 = sadd.s32 1, %s1226_s27 }
   0x9   : > { %p199_p1 = scmp.ne.s32.totalorder %s1210_s23, %s1206_s22  ;;  %p200_p2 = scmp.eq.s32.totalorder %s960_s29, 7 }
   0xa   : > { %s1489_s7 = smov (%p29_p0, %s28_s7), 0  ;;  %s1491_s8 = smov (!%p29_p0, %s31_s8), %s1226_s27 }
   0xb   : > { %1471 = sst [smem:[#allocation9_spill]] %s1489_s7  ;;  %p1320_p3 = por %p200_p2, %p199_p1 }
   0xc   : > { %p205_p4 = scmp.ne.s32.totalorder %s1206_s22, %s1202_s21  ;;  %p33_p5 = scmp.ge.s32.totalorder %s1491_s8, 2 }
   0xd   : > { %p206_p6 = scmp.eq.s32.totalorder %s961_s30, 7  ;;  %p964_p7 = scmp.ge.s32.totalorder %s1230_s28, 1 }
   0xe   : > { %p265_p8 = scmp.lt.s32.totalorder %s1230_s28, 9  ;;  %s1493_s8 = smov (%p33_p5, %s1491_s8), 0 }
   0xf   : > { %1473 = sst [smem:[#allocation10_spill]] %s1493_s8  ;;  %p1330_p9 = por %p206_p6, %p205_p4 }
  0x10   : > { %p266_p10 = pnand %p964_p7, %p265_p8  ;;  %s186_s11 = ssub.s32 %s1226_s27, %s1493_s8 }
  0x11   : > { %s1474_s10 = scalar_select %p1330_p9, 1, 0 }
  0x12   : > { %s189_s12 = sadd.s32 1, %s1210_s23  ;;  %p187_p11 = scmp.eq.s32.totalorder %s186_s11, 0 }
  0x13   : > { %1475 = sst [smem:[#allocation11_spill]] %s1474_s10  ;;  %269 = sbr.rel (%p266_p10) target bundleno = 1020 (0x3fc), region = 44 }
  0x14   : > { %s1338_s13 = scalar_select %p187_p11, %s1210_s23, %s189_s12  }
  0x15   : > { %s1464_s14 = sand.u32 (!%p266_p10), 1, %s1206_s22   ;;  %p313_p12 = scmp.lt.s32.totalorder (!%p266_p10), %s1218_s25, 1 }
  0x16   : > { %1476 = sst [smem:[#allocation12_spill]] %s1338_s13  ;;  %s1344_s15 = sshll.u32 (!%p266_p10), %s1464_s14, 3 }
  0x17   : > { %p317_p13 = scmp.lt.s32.totalorder (!%p266_p10), %s1214_s24, 3  ;;  %s312_s20 = scalar_lea.vmem (!%p266_p10), [#allocation3], %s1344_s15 }
  0x18   : > { %s314_s16 = scalar_select %p313_p12, %s1218_s25, 1 }
  0x19   : > { %s318_s17 = scalar_select %p317_p13, %s1214_s24, 3 }
  0x1a   : > { %s966_s18 = sshll.u32 %s314_s16, 3  ;;  %p974_p0 = scmp.ne.s32.totalorder %s1214_s24, 0 }
  0x1b   : > { %s1352_s29 = scalar_lea.vmem %s1455_s0, %s966_s18  ;;  %s988_s30 = sshll.u32 %s318_s17, 5 }
  0x1c   : > { %s1357_s8 = scalar_lea.vmem %s1456_s1, %s988_s30  ;;  %s326_s14 = scalar_lea.vmem %s1457_s2, %s988_s30 }
  0x1d   : > { %s1365_s23 = scalar_lea.vmem %s1458_s3, %s988_s30  ;;  %s973_s16 = sshll.u32 %s318_s17, 3 }
  0x1e   : > { %s1370_s18 = scalar_lea.vmem %s1459_s4, %s973_s16  ;;  %339 = sbr.rel (%p974_p0) target bundleno = 37 (0x25), region = 48 }
  0x23   : > { %vm340_vm0 = vcmask 261120   ;;  %v1232_v0 = vmov 0.0  }
  0x24   : > { %341 = vst.msk [vmem:[#allocation2] sm:$0xff] %vm340_vm0, %v1232_v0 }
  0x25 PF: > { %v424_v1 = vld [vmem:[%s326_s14 + $0x18] sm:$0xff]  ;;  %v1233_v3 = vmov 0.0   ;;  %v423_v4 = vld [vmem:[%s326_s14 + $0x10] sm:$0xff]  ;;  %v422_v6 = vld [vmem:[%s326_s14 + $0x8] sm:$0xff]  ;;  %vm347_vm1 = vcmask 261120   ;;  %vm1234_vm2 = vmmov 0   ;;  %v647_v19 = vlaneseq }
  0x26   : > { %v346_v2 = vld [vmem:[%s1357_s8 + $0x18] sm:$0xff]  ;;  %1023 = vmatprep.subr.mxu1 %v1233_v3  ;;  %1012 = vmatprep.subr.mxu0 %v1233_v3  ;;  %v345_v5 = vld [vmem:[%s1357_s8 + $0x10] sm:$0xff]  ;;  %v344_v7 = vld [vmem:[%s1357_s8 + $0x8] sm:$0xff]  ;;  %vm569_vm3 = vcmask 64512   ;;  %p982_p1 = scmp.ne.s32.totalorder %s1214_s24, 3 }
  0x27   : > { %1024 = vmatpush3.msra.mxu1 %v424_v1  ;;  %1013 = vmatpush3.msra.mxu0 %v346_v2  ;;  %v421_v8 = vld [vmem:[%s326_s14] sm:$0xff]  ;;  %v498_v11 = vld [vmem:[%s1365_s23 + $0x18] sm:$0xff]  ;;  %v497_v12 = vld [vmem:[%s1365_s23 + $0x10] sm:$0xff]  ;;  %v648_v20 = vshrl.u32 %v647_v19, 7  ;;  %v650_v21 = vand.u32 127, %v647_v19 }
  0x28   : > { %1025 = vmatprep.subr.mxu1 %v1233_v3  ;;  %1014 = vmatprep.subr.mxu0 %v1233_v3  ;;  %v342_v9 = vld [vmem:[%s1352_s29] sm:$0xff]  ;;  %v496_v13 = vld [vmem:[%s1365_s23 + $0x8] sm:$0xff] }
  0x29   : > { %1026 = vmatpush3.msra.mxu1 %v423_v4  ;;  %1015 = vmatpush3.msra.mxu0 %v345_v5  ;;  %v343_v10 = vld [vmem:[%s1357_s8] sm:$0xff]  ;;  %vm651_vm4 = vcmp.le.s32.totalorder %v650_v21, %v648_v20 }
  0x2a   : > { %1027 = vmatprep.subr.mxu1 %v1233_v3  ;;  %1016 = vmatprep.subr.mxu0 %v1233_v3  ;;  %v495_v14 = vld [vmem:[%s1365_s23] sm:$0xff] }
  0x2b   : > { %1028 = vmatpush3.msra.mxu1 %v422_v6  ;;  %1017 = vmatpush3.msra.mxu0 %v344_v7  ;;  %v738_v34 = vld [vmem:[%s1370_s18] sm:$0xff] }
  0x2c   : > { %1029 = vmatprep.subr.mxu1 %v1233_v3  ;;  %1031 = vmatprep.mubr.msk.f32.mxu1 %vm1234_vm2, %v1233_v3  ;;  %v737_v40 = vld [vmem:[#allocation2] sm:$0xff] }
  0x2d   : > { %1030 = vmatpush3.msra.mxu1 %v421_v8  ;;  %1018 = vmatprep.subr.mxu0 %v1233_v3 }
  0x2e   : > { %1032 = vmatmul.mubr.msk.f32.vlgmr.msra.gmra.mxu1 %vm347_vm1, %v342_v9  ;;  %1019 = vmatpush3.msra.mxu0 %v343_v10 }
  0x2f   : > { %1020 = vmatprep.mubr.msk.f32.mxu0 %vm1234_vm2, %v1233_v3  ;;  %1045 = vmatprep.subr.mxu1 %v1233_v3 }
  0x30   : > { %1021 = vmatmul.mubr.msk.f32.vlgmr.msra.gmra.mxu0 %vm347_vm1, %v342_v9  ;;  %1047 = vmatprep.mubr.msk.f32.mxu1 %vm1234_vm2, %v1233_v3 }
  0x31   : > { %1034 = vmatprep.subr.mxu0 %v1233_v3  ;;  %1042 = vmatprep.mubr.msk.f32.mxu0 %vm1234_vm2, %v1233_v3 }
  0x32   : > { %1035 = vmatpush3.msra.mxu0 %v498_v11 }
  0x33   : > { %1036 = vmatprep.subr.mxu0 %v1233_v3 }
  0x34   : > { %1037 = vmatpush3.msra.mxu0 %v497_v12 }
  0x35   : > { %1038 = vmatprep.subr.mxu0 %v1233_v3 }
  0x36   : > { %1039 = vmatpush3.msra.mxu0 %v496_v13 }
  0x37   : > { %1040 = vmatprep.subr.mxu0 %v1233_v3 }
  0x38   : > { %1041 = vmatpush3.msra.mxu0 %v495_v14 }
  0x39   : > { %1043 = vmatmul.mubr.msk.f32.vlgmr.msra.gmra.mxu0 %vm347_vm1, %v342_v9  ;;  %1055 = vmatprep.subr.mxu0 %v1233_v3 }
  0x3a   : > { %1057 = vmatprep.mubr.msk.f32.mxu0 %vm1234_vm2, %v1233_v3  ;;  %1056 = vmatpush3.msra.mxu0 %v738_v34 }
  0xee   : > { %v491_v15 = vpop.f32.mrf.mxu1 }
  0xef   : > { %1046 = vmatpush3.xpose.msk.msra.mxu1 %vm569_vm3, %v491_v15 }
  0xf0   : > { %v417_v16 = vpop.f32.mrf.mxu0  ;;  %v1033_v17 = vpop.f32.mrf.mxu1  ;;  %1050 = vmatprep.subr.mxu1 %v1233_v3 }
  0xf2   : > { %v1022_v18 = vpop.f32.mrf.mxu0  ;;  %1048 = vmatmul.mubr.msk.f32.vlgmr.msra.gmra.mxu1 %vm569_vm3, %v417_v16 }
  0xf3   : > { %1052 = vmatprep.mubr.msk.f32.mxu1 %vm1234_vm2, %v1233_v3 }
  0xf9   : > { %v565_v27 = vpop.f32.mrf.mxu0 }
  0xfa   : > { %1051 = vmatpush3.msra.mxu1 %v565_v27 }
  0xfb   : > { %v1044_v28 = vpop.f32.mrf.mxu0 }
 0x1b2   : > { %v642_v22 = vpop.f32.mrf.mxu1 }
 0x1b3   : > { %v646_v23 = vmul.f32 0.35355338, %v642_v22 }
 0x1b4   : > { %v1049_v24 = vpop.f32.mrf.mxu1 }
 0x1b5   : > { %v652_v25 = vsel %vm651_vm4, %v646_v23, -1e+30 }
 0x1b6   : > { %v653_v26 = vsel %vm569_vm3, %v652_v25, -inf }
 0x1b7   : > { %654 = vmax.xlane.f32.xlu0 %v653_v26 }
 0x240   : > { %v655_v29 = vpop.xlane.xlu0 %654 }
 0x241   : > { %v656_v30 = vsub.f32 %v652_v25, %v655_v29 }
 0x243   : > { %v657_v31 = vmul.f32 1.442695, %v656_v30 }
 0x245   : > { %1134 = vpow2.f32 %v657_v31 }
 0x252   : > { %v1135_v32 = vpop.eup %1134 }
 0x253   : > { %1053 = vmatmul.mubr.msk.f32.vlgmr.msra.gmra.mxu1 %vm569_vm3, %v1135_v32  ;;  %v659_v33 = vsel %vm569_vm3, %v1135_v32, 0.0 }
 0x254   : > { %660 = vadd.xlane.f32.xlu0 %v659_v33 }
 0x2dd   : > { %v661_v35 = vpop.xlane.xlu0 %660 }
 0x2de   : > { %1136 = vrcp.f32 %v661_v35 }
 0x2eb   : > { %v1137_v36 = vpop.eup %1136 }
 0x313   : > { %v731_v37 = vpop.f32.mrf.mxu1 }
 0x314   : > { %v736_v38 = vmul.f32 %v1137_v36, %v731_v37 }
 0x315   : > { %v1054_v39 = vpop.f32.mrf.mxu1 }
 0x316   : > { %1058 = vmatmul.mubr.msk.f32.vlgmr.msra.gmra.mxu0 %vm569_vm3, %v736_v38 }
 0x3d5   : > { %817 = sbr.rel (%p982_p1) target bundleno = 996 (0x3e4), region = 52 }
 0x3d6   : > { %v808_v41 = vpop.f32.mrf.mxu0 }
 0x3d7   : > { %v812_v42 = vadd.f32 %v808_v41, %v737_v40 }
 0x3d8   : > { %v1059_v43 = vpop.f32.mrf.mxu0 }
 0x3d9   : > { %813 = vst.msk [vmem:[#allocation2] sm:$0xff] %vm347_vm1, %v812_v42 }
 0x3da   : > { %v983_v45 = vld [vmem:[%s1460_s5] ss:$0 sm:$0xff] }
 0x3e0   : > { %v818_v44 = vld [vmem:[#allocation2] sm:$0xff] }
 0x3e1   : > { %v826_v46 = vadd.f32 %v983_v45, %v818_v44 }
 0x3e3   : > { %827 = vst.msk [vmem:[%s312_s20] sm:$0xff] %vm347_vm1, %v826_v46 }
 0x3e4 PF: > { %s985_s27 = sshll.u32 %s1218_s25, 7  ;;  %s842_s10 = sshll.u32 %s312_s20, 4  ;;  %s843_s10 = int_to_ptr.vmem [resolvable:$true] %s842_s10 }
 0x3e5   : > { %s840_s24 = scalar_lea.hbm %s1461_s6, %s985_s27  ;;  %s1477_s13 = sand.u32 1, %s1206_s22  }
 0x3e6   : > { %s829_s14 = scalar_lea.sflag [#allocation4], %s1477_s13  ;;  %s1138_s17 = scalar_lea.vmem %s843_s10, 128 }
 0x3e7   : > { %p1139_p2 = scmp.ne.s32.totalorder %s843_s10, %s1138_s17  ;;  %s1235_s29 = smov [#allocation3]  }
 0x3e8   : > { %s1142_s30 = sshll.u32 %s1235_s29, 4  ;;  %s1143_s30 = int_to_ptr.vmem [resolvable:$false] %s1142_s30 }
 0x3e9   : > { %p1140_p4 = pnand %p1139_p2, %p1320_p3  ;;  %s1144_s11 = scalar_lea.vmem %s1143_s30, 256 }
 0x3ea   : > { %p1145_p6 = scmp.lt.s32.totalorder %s843_s10, %s1143_s30  ;;  %p1146_p7 = scmp.lt.s32.totalorder %s1144_s11, %s1138_s17 }
 0x3eb   : > { %p1141_p5 = pneg %p1140_p4 }
 0x3ec   : > { %p1147_p8 = por %p1146_p7, %p1145_p6 }
 0x3ee   : > { %p1148_p10 = pnand %p1147_p8, %p1141_p5 }
 0x3f0   : > { %1151 = shalt.err (!%p1148_p10)
}
 0x3f1   : > { %s1152_s25 = scalar_lea.hbm %s840_s24, 128  ;;  %s1156_s16 = scalar_lea.hbm %s1461_s6, 256 }
 0x3f2   : > { %p1153_p11 = scmp.ne.s32.totalorder %s840_s24, %s1152_s25  ;;  %p1157_p0 = scmp.lt.s32.totalorder %s840_s24, %s1461_s6 }
 0x3f3   : > { %p1158_p1 = scmp.lt.s32.totalorder %s1156_s16, %s1152_s25 }
 0x3f4   : > { %p1154_p12 = pnand %p1153_p11, %p1320_p3 }
 0x3f5   : > { %p1159_p2 = por %p1158_p1, %p1157_p0 }
 0x3f6   : > { %p1155_p13 = pneg %p1154_p12 }
 0x3f8   : > { %p1160_p4 = pnand %p1159_p2, %p1155_p13 }
 0x3fa   : > { %1163 = shalt.err (!%p1160_p4)
}
 0x3fb   : > { %1060 = dma.vmem_to_hbm [thread:$0]  (%p1320_p3), %s843_s10, 128, %s840_s24, %s829_s14  }
 0x3fc PF: > { %p1066_p5 = scmp.ge.s32.totalorder %s1230_s28, 2  ;;  %s854_s23 = sand.u32 1, %s1202_s21  }
 0x3fd   : > { %s855_s26 = scalar_lea.sflag [#allocation4], %s854_s23 }
 0x3fe   : > { %p1063_p6 = pnand %p1066_p5, %p1330_p9 }
 0x400   : > { %p1064_p7 = pneg %p1063_p6 }
 0x402   : > { %1197 = dma.done.wait (%p1064_p7), %s855_s26, 128  }
 0x403   : > { %1199 = vsyncadd (%p1064_p7), %s855_s26, 4294967168  ;;  %s19_s28 = sadd.s32 1, %s1230_s28   ;;  %s1479_s27 = sld [smem:[#allocation6_spill]] }
 0x404   : > { %p16_p8 = scmp.ge.s32.totalorder %s19_s28, 10   ;;  %s1480_s23 = sld [smem:[#allocation12_spill]] }
 0x405   : > { %s1481_s24 = sld [smem:[#allocation7_spill]]  ;;  %s1485_s21 = smov %s1206_s22 }
 0x406   : > { %s1482_s25 = sld [smem:[#allocation8_spill]] }
 0x407   : > { %s1483_s26 = sld [smem:[#allocation9_spill]] }
 0x408   : > { %s1484_s9 = sld [smem:[#allocation10_spill]] }
 0x409   : > { %s1486_s22 = smov %s1479_s27 }
 0x40a   :  { %18 = sbr.rel (!%p16_p8) target bundleno = 5 (0x5), region = 99 }
 0x40e   : > { %s1487_s27 = smov %s1484_s9 }
 0x40f   :  { %860 = vsyncpa [#allocation4], 1 }
 0x410   :  { %862 = vsyncpa [#allocation4 + $0x1], 1 }

</bundles_post_ra>
